<compile_context>
chip_gen: v6e
topology: v6e:2x2x1
jax: 0.10.0
libtpu: 0.0.40
codegen_flags: <defaults>
</compile_context>

<pallas_src>
import functools

import jax
import jax.numpy as jnp
from jax.experimental import pallas as pl
from jax.experimental.pallas import tpu as pltpu

_LANE = 128  # TPU lane width; final-layer weight is padded to this many columns


def _round_up(x, m):
    return (x + m - 1) // m * m


def _classifier_kernel(n_layers, compute_dtype, *refs):
    """refs = [z_ref, W1, b1, ..., Wn, bn, out_ref]; one (TB, d0) batch tile.

    All layers are fused: matmuls hit the MXU (compute_dtype operands, f32
    accumulation), bias/ReLU run in f32 on the VPU, exp + approx reciprocal on
    the EUP.  Weights/biases are VMEM-resident across grid steps (constant
    index_map); only the f32 z tile streams in and a (TB, 1) f32 logit column
    streams out.
    """
    z_ref = refs[0]
    out_ref = refs[-1]
    p = refs[1:-1]

    h = z_ref[...].astype(compute_dtype)

    # Hidden layers: Linear -> ReLU.
    for i in range(n_layers - 1):
        w = p[2 * i][...]          # (d_in, d_out), compute_dtype
        b = p[2 * i + 1][...]      # (1, d_out), float32
        acc = jnp.dot(h, w, preferred_element_type=jnp.float32) + b
        h = jnp.maximum(acc, 0.0).astype(compute_dtype)

    # Final layer: Linear(d_last, 1) -> Sigmoid.  Weight is lane-padded to 128
    # columns (full-width MXU pass); only column 0 is the real logit.
    w_last = p[2 * (n_layers - 1)][...]      # (d_last, 128), compute_dtype
    b_last = p[2 * (n_layers - 1) + 1][...]  # (1, 1), float32
    acc = jnp.dot(h, w_last, preferred_element_type=jnp.float32)
    logit = acc[:, :1] + b_last              # (TB, 1) f32
    # Sign-stable sigmoid: clamp so exp never overflows, then EUP exp + rcp.
    logit = jnp.clip(logit, -30.0, 30.0)
    prob = pl.reciprocal(1.0 + jnp.exp(-logit), approx=True)
    out_ref[...] = prob.astype(out_ref.dtype)


def classifier_forward(z, params, *, block_b=4096, compute_dtype=jnp.bfloat16):
    """z: (B, dims_layers[0]) float32. params: list of (W:(in,out), b:(1,out)) float32."""
    n_layers = len(params)
    B, d0 = z.shape
    out_dtype = z.dtype

    # --- parameter prep ------------------------------------------------------
    # Cast weights once to the matmul operand dtype; keep biases f32 (added to
    # the f32 accumulator).  Pad only the final (d_last, 1) weight to 128
    # columns; its bias stays a (1, 1) scalar added after slicing column 0.
    flat_params = []
    for li, (w, b) in enumerate(params):
        if li == n_layers - 1:
            pad = _LANE - w.shape[1]
            if pad > 0:
                w = jnp.pad(w, ((0, 0), (0, pad)))
            b = b[:, :1].astype(jnp.float32)                 # (1, 1)
        else:
            b = b.astype(jnp.float32)                        # (1, d_out)
        flat_params += [w.astype(compute_dtype), b]

    # --- batch tiling --------------------------------------------------------
    # bf16 operands pack 16 rows per vreg; align the tile accordingly.
    sub = 16 if jnp.dtype(compute_dtype) == jnp.dtype(jnp.bfloat16) else 8
    tb = _round_up(max(sub, min(block_b, _round_up(B, sub))), sub)
    grid_b = pl.cdiv(B, tb)
    rows_out = grid_b * tb                 # tile-aligned output rows; slice [:B] later
    if B < tb:
        # Tiny pad only when the whole batch fits in one tile; large batches
        # use ragged edge blocks instead of a full extra HBM pad pass.
        z = jnp.pad(z, ((0, tb - B), (0, 0)))
    # NOTE: z intentionally stays f32; the kernel casts it to compute_dtype.

    in_specs = [pl.BlockSpec((tb, d0), lambda i: (i, 0))]
    for prm in flat_params:
        # Constant index_map -> weights/biases stay resident in VMEM across steps.
        in_specs.append(pl.BlockSpec(prm.shape, lambda i: (0, 0)))
    out_specs = pl.BlockSpec((tb, 1), lambda i: (i, 0))

    # Advisory cost estimate so XLA schedules around the custom call sensibly.
    dims_io = [(w.shape[0], w.shape[1]) for w, _ in params]
    flops = 2 * rows_out * sum(di * do for di, do in dims_io)
    param_bytes = sum(int(prm.size) * prm.dtype.itemsize for prm in flat_params)
    bytes_accessed = int(z.size) * z.dtype.itemsize + param_bytes + rows_out * 4
    cost = pl.CostEstimate(
        flops=flops, transcendentals=rows_out, bytes_accessed=bytes_accessed
    )

    kernel = functools.partial(_classifier_kernel, n_layers, compute_dtype)

    def _call(dim_semantics):
        return pl.pallas_call(
            kernel,
            out_shape=jax.ShapeDtypeStruct((rows_out, 1), jnp.float32),
            grid=(grid_b,),
            in_specs=in_specs,
            out_specs=out_specs,
            compiler_params=pltpu.CompilerParams(
                dimension_semantics=dim_semantics,
                vmem_limit_bytes=32 * 1024 * 1024,
            ),
            cost_estimate=cost,
        )(z, *flat_params)

    # Prefer CORE_PARALLEL on the batch axis (engages both TensorCores on v7x);
    # fall back to plain "parallel" if the current chip / jax rejects it.
    # (Eager dispatch compiles here, so failures surface synchronously.)
    semantics_options = []
    core_parallel = getattr(pltpu, "CORE_PARALLEL", None)
    if core_parallel is not None:
        semantics_options.append((core_parallel,))
    semantics_options.append(("parallel",))

    out = None
    last_err = None
    for sem in semantics_options:
        try:
            out = _call(sem)
            break
        except Exception as e:  # noqa: BLE001 - fallback across chip generations
            last_err = e
            out = None
    if out is None:
        raise last_err

    return out[:B].astype(out_dtype)


def init_classifier_params(key, dims_layers):
    """Deterministic init mirroring nn.Linear's default U(-1/sqrt(fan_in), 1/sqrt(fan_in))."""
    sizes = [(dims_layers[i - 1], dims_layers[i]) for i in range(1, len(dims_layers))]
    sizes.append((dims_layers[-1], 1))  # final Linear(dims_layers[-1], 1)

    params = []
    for fan_in, fan_out in sizes:
        key, kw, kb = jax.random.split(key, 3)
        bound = 1.0 / float(fan_in) ** 0.5
        w = jax.random.uniform(kw, (fan_in, fan_out), jnp.float32, -bound, bound)
        b = jax.random.uniform(kb, (1, fan_out), jnp.float32, -bound, bound)
        params.append((w, b))
    return params


def classifier_reference(z, params):
    """Pure-JAX reference of the same forward pass (for correctness check)."""
    h = z
    n = len(params)
    for i, (w, b) in enumerate(params):
        h = h @ w + b
        if i < n - 1:
            h = jnp.maximum(h, 0.0)
        else:
            h = jax.nn.sigmoid(h)
    return h


if __name__ == "__main__":
    key = jax.random.PRNGKey(0)

    # Classifier(dims_layers=[32, 64, 32]) applied to a batch of 8 latent codes.
    dims_layers = [32, 64, 32]
    batch = 8

    key, kz, kp = jax.random.split(key, 3)
    z = jax.random.normal(kz, (batch, dims_layers[0]), jnp.float32)
    params = init_classifier_params(kp, dims_layers)

    ref = classifier_reference(z, params)

    # fp32-operand path: tight numerical check (tolerance covers approx reciprocal).
    out_f32 = jax.block_until_ready(
        classifier_forward(z, params, compute_dtype=jnp.float32)
    )
    assert out_f32.shape == (batch, 1), out_f32.shape
    assert jnp.allclose(out_f32, ref, atol=5e-3, rtol=0), "fp32 path mismatch vs reference"

    # Default bf16-operand path (perf configuration): looser tolerance
    # (documented: probabilities accurate to ~3e-2 with bf16 MXU operands).
    out_bf16 = jax.block_until_ready(classifier_forward(z, params))
    assert out_bf16.shape == (batch, 1), out_bf16.shape
    assert jnp.allclose(out_bf16, ref, atol=3e-2, rtol=0), "bf16 path mismatch vs reference"

    print("KERNEL_OK")
</pallas_src>

<mosaic_0001>
module attributes {stable_mosaic.version = 11 : i64} {
  func.func @_classifier_kernel(%arg0: i32, %arg1: memref<8x32xf32, #tpu.memory_space<vmem>>, %arg2: memref<32x64xf32, #tpu.memory_space<vmem>>, %arg3: memref<1x64xf32, #tpu.memory_space<vmem>>, %arg4: memref<64x32xf32, #tpu.memory_space<vmem>>, %arg5: memref<1x32xf32, #tpu.memory_space<vmem>>, %arg6: memref<32x128xf32, #tpu.memory_space<vmem>>, %arg7: memref<1x1xf32, #tpu.memory_space<vmem>>, %arg8: memref<8x1xf32, #tpu.memory_space<vmem>>) attributes {dimension_semantics = [#tpu.dimension_semantics<core_parallel>], iteration_bounds = array<i64: 1>, scalar_prefetch = 0 : i64, scratch_operands = 0 : i64, tpu.core_type = #tpu.core_type<tc>, window_params = [{transform_indices = @transform_0, window_bounds = array<i64: 8, 32>}, {pipeline_mode = #tpu.pipeline_mode<synchronous>, transform_indices = @transform_1, window_bounds = array<i64: 32, 64>}, {pipeline_mode = #tpu.pipeline_mode<synchronous>, transform_indices = @transform_2, window_bounds = array<i64: 1, 64>}, {pipeline_mode = #tpu.pipeline_mode<synchronous>, transform_indices = @transform_3, window_bounds = array<i64: 64, 32>}, {pipeline_mode = #tpu.pipeline_mode<synchronous>, transform_indices = @transform_4, window_bounds = array<i64: 1, 32>}, {pipeline_mode = #tpu.pipeline_mode<synchronous>, transform_indices = @transform_5, window_bounds = array<i64: 32, 128>}, {pipeline_mode = #tpu.pipeline_mode<synchronous>, transform_indices = @transform_6, window_bounds = array<i64: 1, 1>}, {transform_indices = @transform_7, window_bounds = array<i64: 8, 1>}]} {
    %c0 = arith.constant 0 : index
    %c0_0 = arith.constant 0 : index
    %0 = vector.load %arg1[%c0, %c0_0] : memref<8x32xf32, #tpu.memory_space<vmem>>, vector<8x32xf32>
    %c0_1 = arith.constant 0 : index
    %c0_2 = arith.constant 0 : index
    %1 = vector.load %arg2[%c0_1, %c0_2] : memref<32x64xf32, #tpu.memory_space<vmem>>, vector<32x64xf32>
    %c0_3 = arith.constant 0 : index
    %c0_4 = arith.constant 0 : index
    %2 = vector.load %arg3[%c0_3, %c0_4] : memref<1x64xf32, #tpu.memory_space<vmem>>, vector<1x64xf32>
    %cst = arith.constant dense<0.000000e+00> : vector<8x64xf32>
    %3 = tpu.matmul %0, %1, %cst {dimension_numbers = #tpu.dot_dimension_numbers<[1], [0], [0], [1], [0, 0, 1, 1], [], []>} : vector<8x32xf32>, vector<32x64xf32>, vector<8x64xf32> -> vector<8x64xf32>
    %4 = vector.broadcast %2 : vector<1x64xf32> to vector<8x64xf32>
    %5 = arith.addf %3, %4 : vector<8x64xf32>
    %cst_5 = arith.constant 0.000000e+00 : f32
    %6 = vector.broadcast %cst_5 : f32 to vector<8x64xf32>
    %7 = arith.maximumf %5, %6 : vector<8x64xf32>
    %c0_6 = arith.constant 0 : index
    %c0_7 = arith.constant 0 : index
    %8 = vector.load %arg4[%c0_6, %c0_7] : memref<64x32xf32, #tpu.memory_space<vmem>>, vector<64x32xf32>
    %c0_8 = arith.constant 0 : index
    %c0_9 = arith.constant 0 : index
    %9 = vector.load %arg5[%c0_8, %c0_9] : memref<1x32xf32, #tpu.memory_space<vmem>>, vector<1x32xf32>
    %cst_10 = arith.constant dense<0.000000e+00> : vector<8x32xf32>
    %10 = tpu.matmul %7, %8, %cst_10 {dimension_numbers = #tpu.dot_dimension_numbers<[1], [0], [0], [1], [0, 0, 1, 1], [], []>} : vector<8x64xf32>, vector<64x32xf32>, vector<8x32xf32> -> vector<8x32xf32>
    %11 = vector.broadcast %9 : vector<1x32xf32> to vector<8x32xf32>
    %12 = arith.addf %10, %11 : vector<8x32xf32>
    %cst_11 = arith.constant 0.000000e+00 : f32
    %13 = vector.broadcast %cst_11 : f32 to vector<8x32xf32>
    %14 = arith.maximumf %12, %13 : vector<8x32xf32>
    %c0_12 = arith.constant 0 : index
    %c0_13 = arith.constant 0 : index
    %15 = vector.load %arg6[%c0_12, %c0_13] : memref<32x128xf32, #tpu.memory_space<vmem>>, vector<32x128xf32>
    %c0_14 = arith.constant 0 : index
    %c0_15 = arith.constant 0 : index
    %16 = vector.load %arg7[%c0_14, %c0_15] : memref<1x1xf32, #tpu.memory_space<vmem>>, vector<1x1xf32>
    %cst_16 = arith.constant dense<0.000000e+00> : vector<8x128xf32>
    %17 = tpu.matmul %14, %15, %cst_16 {dimension_numbers = #tpu.dot_dimension_numbers<[1], [0], [0], [1], [0, 0, 1, 1], [], []>} : vector<8x32xf32>, vector<32x128xf32>, vector<8x128xf32> -> vector<8x128xf32>
    %18 = vector.extract_strided_slice %17 {offsets = [0, 0], sizes = [8, 1], strides = [1, 1]} : vector<8x128xf32> to vector<8x1xf32>
    %19 = vector.broadcast %16 : vector<1x1xf32> to vector<8x1xf32>
    %20 = arith.addf %18, %19 : vector<8x1xf32>
    %cst_17 = arith.constant -3.000000e+01 : f32
    %cst_18 = arith.constant 3.000000e+01 : f32
    %21 = vector.broadcast %cst_17 : f32 to vector<8x1xf32>
    %22 = arith.maximumf %21, %20 : vector<8x1xf32>
    %23 = vector.broadcast %cst_18 : f32 to vector<8x1xf32>
    %24 = arith.minimumf %23, %22 : vector<8x1xf32>
    %cst_19 = arith.constant 0.000000e+00 : f32
    %25 = vector.broadcast %cst_19 : f32 to vector<8x1xf32>
    %26 = arith.subf %25, %24 : vector<8x1xf32>
    %27 = math.exp %26 : vector<8x1xf32>
    %cst_20 = arith.constant 1.000000e+00 : f32
    %28 = vector.broadcast %cst_20 : f32 to vector<8x1xf32>
    %29 = arith.addf %28, %27 : vector<8x1xf32>
    %30 = tpu.reciprocal %29 {approx = true} : vector<8x1xf32> -> vector<8x1xf32>
    %c0_21 = arith.constant 0 : index
    %c0_22 = arith.constant 0 : index
    %31 = vector.load %arg8[%c0_21, %c0_22] : memref<8x1xf32, #tpu.memory_space<vmem>>, vector<8x1xf32>
    tpu.vector_store %arg8[%c0_21, %c0_22], %30 {strides = array<i32>} : memref<8x1xf32, #tpu.memory_space<vmem>>, vector<8x1xf32>,
    return
  }
  func.func @transform_0(%arg0: i32) -> (i32, i32) {
    %c0_i32 = arith.constant 0 : i32
    %c0_i32_0 = arith.constant 0 : i32
    return %arg0, %c0_i32 : i32, i32
  }
  func.func @transform_1(%arg0: i32) -> (i32, i32) {
    %c0_i32 = arith.constant 0 : i32
    %c0_i32_0 = arith.constant 0 : i32
    %c0_i32_1 = arith.constant 0 : i32
    return %c0_i32, %c0_i32_0 : i32, i32
  }
  func.func @transform_2(%arg0: i32) -> (i32, i32) {
    %c0_i32 = arith.constant 0 : i32
    %c0_i32_0 = arith.constant 0 : i32
    %c0_i32_1 = arith.constant 0 : i32
    return %c0_i32, %c0_i32_0 : i32, i32
  }
  func.func @transform_3(%arg0: i32) -> (i32, i32) {
    %c0_i32 = arith.constant 0 : i32
    %c0_i32_0 = arith.constant 0 : i32
    %c0_i32_1 = arith.constant 0 : i32
    return %c0_i32, %c0_i32_0 : i32, i32
  }
  func.func @transform_4(%arg0: i32) -> (i32, i32) {
    %c0_i32 = arith.constant 0 : i32
    %c0_i32_0 = arith.constant 0 : i32
    %c0_i32_1 = arith.constant 0 : i32
    return %c0_i32, %c0_i32_0 : i32, i32
  }
  func.func @transform_5(%arg0: i32) -> (i32, i32) {
    %c0_i32 = arith.constant 0 : i32
    %c0_i32_0 = arith.constant 0 : i32
    %c0_i32_1 = arith.constant 0 : i32
    return %c0_i32, %c0_i32_0 : i32, i32
  }
  func.func @transform_6(%arg0: i32) -> (i32, i32) {
    %c0_i32 = arith.constant 0 : i32
    %c0_i32_0 = arith.constant 0 : i32
    %c0_i32_1 = arith.constant 0 : i32
    return %c0_i32, %c0_i32_0 : i32, i32
  }
  func.func @transform_7(%arg0: i32) -> (i32, i32) {
    %c0_i32 = arith.constant 0 : i32
    %c0_i32_0 = arith.constant 0 : i32
    return %arg0, %c0_i32 : i32, i32
  }
}

module attributes {stable_mosaic.version = 11 : i64} {
  func.func @_classifier_kernel(%arg0: i32, %arg1: memref<8x32xf32, #tpu.memory_space<vmem>>, %arg2: memref<32x64xf32, #tpu.memory_space<vmem>>, %arg3: memref<1x64xf32, #tpu.memory_space<vmem>>, %arg4: memref<64x32xf32, #tpu.memory_space<vmem>>, %arg5: memref<1x32xf32, #tpu.memory_space<vmem>>, %arg6: memref<32x128xf32, #tpu.memory_space<vmem>>, %arg7: memref<1x1xf32, #tpu.memory_space<vmem>>, %arg8: memref<8x1xf32, #tpu.memory_space<vmem>>) attributes {dimension_semantics = [#tpu.dimension_semantics<parallel>], iteration_bounds = array<i64: 1>, scalar_prefetch = 0 : i64, scratch_operands = 0 : i64, tpu.core_type = #tpu.core_type<tc>, window_params = [{transform_indices = @transform_0, window_bounds = array<i64: 8, 32>}, {pipeline_mode = #tpu.pipeline_mode<synchronous>, transform_indices = @transform_1, window_bounds = array<i64: 32, 64>}, {pipeline_mode = #tpu.pipeline_mode<synchronous>, transform_indices = @transform_2, window_bounds = array<i64: 1, 64>}, {pipeline_mode = #tpu.pipeline_mode<synchronous>, transform_indices = @transform_3, window_bounds = array<i64: 64, 32>}, {pipeline_mode = #tpu.pipeline_mode<synchronous>, transform_indices = @transform_4, window_bounds = array<i64: 1, 32>}, {pipeline_mode = #tpu.pipeline_mode<synchronous>, transform_indices = @transform_5, window_bounds = array<i64: 32, 128>}, {pipeline_mode = #tpu.pipeline_mode<synchronous>, transform_indices = @transform_6, window_bounds = array<i64: 1, 1>}, {transform_indices = @transform_7, window_bounds = array<i64: 8, 1>}]} {
    %c0 = arith.constant 0 : index
    %c0_0 = arith.constant 0 : index
    %0 = vector.load %arg1[%c0, %c0_0] : memref<8x32xf32, #tpu.memory_space<vmem>>, vector<8x32xf32>
    %c0_1 = arith.constant 0 : index
    %c0_2 = arith.constant 0 : index
    %1 = vector.load %arg2[%c0_1, %c0_2] : memref<32x64xf32, #tpu.memory_space<vmem>>, vector<32x64xf32>
    %c0_3 = arith.constant 0 : index
    %c0_4 = arith.constant 0 : index
    %2 = vector.load %arg3[%c0_3, %c0_4] : memref<1x64xf32, #tpu.memory_space<vmem>>, vector<1x64xf32>
    %cst = arith.constant dense<0.000000e+00> : vector<8x64xf32>
    %3 = tpu.matmul %0, %1, %cst {dimension_numbers = #tpu.dot_dimension_numbers<[1], [0], [0], [1], [0, 0, 1, 1], [], []>} : vector<8x32xf32>, vector<32x64xf32>, vector<8x64xf32> -> vector<8x64xf32>
    %4 = vector.broadcast %2 : vector<1x64xf32> to vector<8x64xf32>
    %5 = arith.addf %3, %4 : vector<8x64xf32>
    %cst_5 = arith.constant 0.000000e+00 : f32
    %6 = vector.broadcast %cst_5 : f32 to vector<8x64xf32>
    %7 = arith.maximumf %5, %6 : vector<8x64xf32>
    %c0_6 = arith.constant 0 : index
    %c0_7 = arith.constant 0 : index
    %8 = vector.load %arg4[%c0_6, %c0_7] : memref<64x32xf32, #tpu.memory_space<vmem>>, vector<64x32xf32>
    %c0_8 = arith.constant 0 : index
    %c0_9 = arith.constant 0 : index
    %9 = vector.load %arg5[%c0_8, %c0_9] : memref<1x32xf32, #tpu.memory_space<vmem>>, vector<1x32xf32>
    %cst_10 = arith.constant dense<0.000000e+00> : vector<8x32xf32>
    %10 = tpu.matmul %7, %8, %cst_10 {dimension_numbers = #tpu.dot_dimension_numbers<[1], [0], [0], [1], [0, 0, 1, 1], [], []>} : vector<8x64xf32>, vector<64x32xf32>, vector<8x32xf32> -> vector<8x32xf32>
    %11 = vector.broadcast %9 : vector<1x32xf32> to vector<8x32xf32>
    %12 = arith.addf %10, %11 : vector<8x32xf32>
    %cst_11 = arith.constant 0.000000e+00 : f32
    %13 = vector.broadcast %cst_11 : f32 to vector<8x32xf32>
    %14 = arith.maximumf %12, %13 : vector<8x32xf32>
    %c0_12 = arith.constant 0 : index
    %c0_13 = arith.constant 0 : index
    %15 = vector.load %arg6[%c0_12, %c0_13] : memref<32x128xf32, #tpu.memory_space<vmem>>, vector<32x128xf32>
    %c0_14 = arith.constant 0 : index
    %c0_15 = arith.constant 0 : index
    %16 = vector.load %arg7[%c0_14, %c0_15] : memref<1x1xf32, #tpu.memory_space<vmem>>, vector<1x1xf32>
    %cst_16 = arith.constant dense<0.000000e+00> : vector<8x128xf32>
    %17 = tpu.matmul %14, %15, %cst_16 {dimension_numbers = #tpu.dot_dimension_numbers<[1], [0], [0], [1], [0, 0, 1, 1], [], []>} : vector<8x32xf32>, vector<32x128xf32>, vector<8x128xf32> -> vector<8x128xf32>
    %18 = vector.extract_strided_slice %17 {offsets = [0, 0], sizes = [8, 1], strides = [1, 1]} : vector<8x128xf32> to vector<8x1xf32>
    %19 = vector.broadcast %16 : vector<1x1xf32> to vector<8x1xf32>
    %20 = arith.addf %18, %19 : vector<8x1xf32>
    %cst_17 = arith.constant -3.000000e+01 : f32
    %cst_18 = arith.constant 3.000000e+01 : f32
    %21 = vector.broadcast %cst_17 : f32 to vector<8x1xf32>
    %22 = arith.maximumf %21, %20 : vector<8x1xf32>
    %23 = vector.broadcast %cst_18 : f32 to vector<8x1xf32>
    %24 = arith.minimumf %23, %22 : vector<8x1xf32>
    %cst_19 = arith.constant 0.000000e+00 : f32
    %25 = vector.broadcast %cst_19 : f32 to vector<8x1xf32>
    %26 = arith.subf %25, %24 : vector<8x1xf32>
    %27 = math.exp %26 : vector<8x1xf32>
    %cst_20 = arith.constant 1.000000e+00 : f32
    %28 = vector.broadcast %cst_20 : f32 to vector<8x1xf32>
    %29 = arith.addf %28, %27 : vector<8x1xf32>
    %30 = tpu.reciprocal %29 {approx = true} : vector<8x1xf32> -> vector<8x1xf32>
    %c0_21 = arith.constant 0 : index
    %c0_22 = arith.constant 0 : index
    %31 = vector.load %arg8[%c0_21, %c0_22] : memref<8x1xf32, #tpu.memory_space<vmem>>, vector<8x1xf32>
    tpu.vector_store %arg8[%c0_21, %c0_22], %30 {strides = array<i32>} : memref<8x1xf32, #tpu.memory_space<vmem>>, vector<8x1xf32>,
    return
  }
  func.func @transform_0(%arg0: i32) -> (i32, i32) {
    %c0_i32 = arith.constant 0 : i32
    %c0_i32_0 = arith.constant 0 : i32
    return %arg0, %c0_i32 : i32, i32
  }
  func.func @transform_1(%arg0: i32) -> (i32, i32) {
    %c0_i32 = arith.constant 0 : i32
    %c0_i32_0 = arith.constant 0 : i32
    %c0_i32_1 = arith.constant 0 : i32
    return %c0_i32, %c0_i32_0 : i32, i32
  }
  func.func @transform_2(%arg0: i32) -> (i32, i32) {
    %c0_i32 = arith.constant 0 : i32
    %c0_i32_0 = arith.constant 0 : i32
    %c0_i32_1 = arith.constant 0 : i32
    return %c0_i32, %c0_i32_0 : i32, i32
  }
  func.func @transform_3(%arg0: i32) -> (i32, i32) {
    %c0_i32 = arith.constant 0 : i32
    %c0_i32_0 = arith.constant 0 : i32
    %c0_i32_1 = arith.constant 0 : i32
    return %c0_i32, %c0_i32_0 : i32, i32
  }
  func.func @transform_4(%arg0: i32) -> (i32, i32) {
    %c0_i32 = arith.constant 0 : i32
    %c0_i32_0 = arith.constant 0 : i32
    %c0_i32_1 = arith.constant 0 : i32
    return %c0_i32, %c0_i32_0 : i32, i32
  }
  func.func @transform_5(%arg0: i32) -> (i32, i32) {
    %c0_i32 = arith.constant 0 : i32
    %c0_i32_0 = arith.constant 0 : i32
    %c0_i32_1 = arith.constant 0 : i32
    return %c0_i32, %c0_i32_0 : i32, i32
  }
  func.func @transform_6(%arg0: i32) -> (i32, i32) {
    %c0_i32 = arith.constant 0 : i32
    %c0_i32_0 = arith.constant 0 : i32
    %c0_i32_1 = arith.constant 0 : i32
    return %c0_i32, %c0_i32_0 : i32, i32
  }
  func.func @transform_7(%arg0: i32) -> (i32, i32) {
    %c0_i32 = arith.constant 0 : i32
    %c0_i32_0 = arith.constant 0 : i32
    return %arg0, %c0_i32 : i32, i32
  }
}

</mosaic_0001>

<bundles_post_ra>
// kernel: tpu_custom_call.1
= control target key start
LH: loop header
LB: loop body
LE: loop exit
PB: predicated region body
PF: predicated region fallthrough
CT: control target
= control target key end

     0   :  { %v420_v0 = vmov 0.0   ;;  %vm421_vm0 = vmmov 0   ;;  %vm60_vm1 = vcmask 261120   ;;  %vm150_vm2 = vcmask 523264   ;;  %s530_s1 = inlined_call_operand.vmem [shape: f32[32,64], index: 1, kind: input, shape index: {}]   ;;  %s531_s3 = inlined_call_operand.vmem [shape: f32[64,32], index: 3, kind: input, shape index: {}]   ;;  %s532_s0 = inlined_call_operand.vmem [shape: f32[8,32], index: 0, kind: input, shape index: {}]   ;;  %s533_s5 = inlined_call_operand.vmem [shape: f32[32,128], index: 5, kind: input, shape index: {}]   ;;  %s534_s2 = inlined_call_operand.vmem [shape: f32[1,64], index: 2, kind: input, shape index: {}]   ;;  %s535_s6 = inlined_call_operand.<no memory space> [shape: f32[1,1], index: 6, kind: input, shape index: {}]   ;;  %s536_s4 = inlined_call_operand.vmem [shape: f32[1,32], index: 4, kind: input, shape index: {}]   ;;  %s537_s7 = inlined_call_operand.vmem [shape: f32[8,1], index: 7, kind: output, shape index: {}]  }
   0x1   :  { %373 = vmatprep.subr.mxu0 %v420_v0  ;;  %v52_v1 = vld [vmem:[%s530_s1 + $0x18] sm:$0xff]  ;;  %v51_v2 = vld [vmem:[%s530_s1 + $0x10] sm:$0xff]  ;;  %381 = vmatprep.mubr.msk.f32.mxu0 %vm421_vm0, %v420_v0  ;;  %v50_v5 = vld [vmem:[%s530_s1 + $0x8] sm:$0xff]  ;;  %v12_v23 = vstv %s535_s6  ;;  %vm317_vm3 = vcmask 7168  }
   0x2   :  { %374 = vmatpush3.msra.mxu0 %v52_v1  ;;  %384 = vmatprep.subr.mxu1 %v420_v0  ;;  %v142_v3 = vld [vmem:[%s531_s3 + $0x38] sm:$0xff]  ;;  %v141_v4 = vld [vmem:[%s531_s3 + $0x30] sm:$0xff]  ;;  %v140_v6 = vld [vmem:[%s531_s3 + $0x28] sm:$0xff]  ;;  %13 = vst [vmem:[#allocation2] sm:$0x1] %v12_v23 }
   0x3   :  { %375 = vmatprep.subr.mxu0 %v420_v0  ;;  %385 = vmatpush3.msra.mxu1 %v142_v3  ;;  %v49_v7 = vld [vmem:[%s530_s1] sm:$0xff]  ;;  %v138_v9 = vld [vmem:[%s531_s3 + $0x18] sm:$0xff]  ;;  %v137_v11 = vld [vmem:[%s531_s3 + $0x10] sm:$0xff] }
   0x4   :  { %376 = vmatpush3.msra.mxu0 %v51_v2  ;;  %386 = vmatprep.subr.mxu1 %v420_v0  ;;  %v139_v8 = vld [vmem:[%s531_s3 + $0x20] sm:$0xff]  ;;  %v136_v12 = vld [vmem:[%s531_s3 + $0x8] sm:$0xff]  ;;  %v228_v14 = vld [vmem:[%s533_s5 + $0x18] sm:$0xff] }
   0x5   :  { %377 = vmatprep.subr.mxu0 %v420_v0  ;;  %387 = vmatpush3.msra.mxu1 %v141_v4  ;;  %v48_v10 = vld [vmem:[%s532_s0] sm:$0xff]  ;;  %v227_v20 = vld [vmem:[%s533_s5 + $0x10] sm:$0xff]  ;;  %v226_v21 = vld [vmem:[%s533_s5 + $0x8] sm:$0xff] }
   0x6   :  { %378 = vmatpush3.msra.mxu0 %v50_v5  ;;  %388 = vmatprep.subr.mxu1 %v420_v0  ;;  %v135_v13 = vld [vmem:[%s531_s3] sm:$0xff] }
   0x7   :  { %379 = vmatprep.subr.mxu0 %v420_v0  ;;  %389 = vmatpush3.msra.mxu1 %v140_v6  ;;  %v347_v15 = vld [vmem:[%s534_s2] ss:$0 sm:$0xff] }
   0x8   :  { %380 = vmatpush3.msra.mxu0 %v49_v7  ;;  %390 = vmatprep.subr.mxu1 %v420_v0  ;;  %v225_v22 = vld [vmem:[%s533_s5] sm:$0xff] }
   0x9   :  { %391 = vmatpush3.msra.mxu1 %v139_v8  ;;  %400 = vmatprep.mubr.msk.f32.mxu1 %vm421_vm0, %v420_v0  ;;  %v349_v24 = vld [vmem:[%s536_s4] ss:$0 sm:$0xff] }
   0xa   :  { %392 = vmatprep.subr.mxu1 %v420_v0  ;;  %403 = vmatprep.subr.mxu0 %v420_v0  ;;  %v352_v29 = vld [vmem:[#allocation2] ss:$0 sm:$0xff] }
   0xb   :  { %382 = vmatmul.mubr.msk.f32.vlgmr.msra.gmra.mxu0 %vm60_vm1, %v48_v10  ;;  %393 = vmatpush3.msra.mxu1 %v138_v9 }
   0xc   :  { %394 = vmatprep.subr.mxu1 %v420_v0  ;;  %411 = vmatprep.mubr.msk.f32.mxu0 %vm421_vm0, %v420_v0 }
   0xd   :  { %395 = vmatpush3.msra.mxu1 %v137_v11  ;;  %404 = vmatpush3.msra.mxu0 %v228_v14 }
   0xe   :  { %396 = vmatprep.subr.mxu1 %v420_v0  ;;  %405 = vmatprep.subr.mxu0 %v420_v0 }
   0xf   :  { %397 = vmatpush3.msra.mxu1 %v136_v12  ;;  %406 = vmatpush3.msra.mxu0 %v227_v20 }
  0x10   :  { %398 = vmatprep.subr.mxu1 %v420_v0  ;;  %407 = vmatprep.subr.mxu0 %v420_v0 }
  0x11   :  { %399 = vmatpush3.msra.mxu1 %v135_v13  ;;  %408 = vmatpush3.msra.mxu0 %v226_v21 }
  0x12   :  { %409 = vmatprep.subr.mxu0 %v420_v0 }
  0x13   :  { %410 = vmatpush3.msra.mxu0 %v225_v22 }
  0xcb   :  { %v130_v16 = vpop.f32.mrf.mxu0 }
  0xcc   :  { %v131_v17 = vadd.f32 %v347_v15, %v130_v16 }
  0xcd   :  { %v383_v18 = vpop.f32.mrf.mxu0 }
  0xce   :  { %v134_v19 = vmax.f32 %v131_v17, 0.0 }
  0xd0   :  { %401 = vmatmul.mubr.msk.f32.vlgmr.msra.gmra.mxu1 %vm150_vm2, %v134_v19 }
 0x190   :  { %v220_v25 = vpop.f32.mrf.mxu1 }
 0x191   :  { %v221_v26 = vadd.f32 %v349_v24, %v220_v25 }
 0x192   :  { %v402_v27 = vpop.f32.mrf.mxu1 }
 0x193   :  { %v224_v28 = vmax.f32 %v221_v26, 0.0 }
 0x195   :  { %412 = vmatmul.mubr.msk.f32.vlgmr.msra.gmra.mxu0 %vm60_vm1, %v224_v28 }
 0x255   :  { %v299_v30 = vpop.f32.mrf.mxu0 }
 0x256   :  { %v309_v31 = vadd.f32 %v352_v29, %v299_v30 }
 0x257   :  { %v413_v32 = vpop.f32.mrf.mxu0 }
 0x258   :  { %v353_v33 = vclamps-f32 %v309_v31, 30.0 }
 0x25a   :  { %v312_v34 = vsub.f32 0.0, %v353_v33 }
 0x25c   :  { %v313_v35 = vmul.f32 1.442695, %v312_v34 }
 0x25e   :  { %416 = vpow2.f32 %v313_v35 }
 0x26b   :  { %v417_v36 = vpop.eup %416 }
 0x26c   :  { %v315_v37 = vadd.f32 1.0, %v417_v36 }
 0x26e   :  { %418 = vrcp.f32 %v315_v37 }
 0x27b   :  { %v419_v38 = vpop.eup %418 }
 0x27c   :  { %318 = vst.msk [vmem:[%s537_s7] sm:$0xff] %vm317_vm3, %v419_v38 }

// kernel: tpu_custom_call.1
= control target key start
LH: loop header
LB: loop body
LE: loop exit
PB: predicated region body
PF: predicated region fallthrough
CT: control target
= control target key end

     0   :  { %v376_v0 = vmov 0.0   ;;  %vm377_vm0 = vmmov 0   ;;  %vm40_vm1 = vcmask 261120   ;;  %vm130_vm2 = vcmask 523264   ;;  %s486_s1 = inlined_call_operand.vmem [shape: f32[32,64], index: 1, kind: input, shape index: {}]   ;;  %s487_s3 = inlined_call_operand.vmem [shape: f32[64,32], index: 3, kind: input, shape index: {}]   ;;  %s488_s0 = inlined_call_operand.vmem [shape: f32[8,32], index: 0, kind: input, shape index: {}]   ;;  %s489_s5 = inlined_call_operand.vmem [shape: f32[32,128], index: 5, kind: input, shape index: {}]   ;;  %s490_s2 = inlined_call_operand.vmem [shape: f32[1,64], index: 2, kind: input, shape index: {}]   ;;  %s491_s6 = inlined_call_operand.<no memory space> [shape: f32[1,1], index: 6, kind: input, shape index: {}]   ;;  %s492_s4 = inlined_call_operand.vmem [shape: f32[1,32], index: 4, kind: input, shape index: {}]   ;;  %s493_s7 = inlined_call_operand.vmem [shape: f32[8,1], index: 7, kind: output, shape index: {}]  }
   0x1   :  { %329 = vmatprep.subr.mxu0 %v376_v0  ;;  %v32_v1 = vld [vmem:[%s486_s1 + $0x18] sm:$0xff]  ;;  %v31_v2 = vld [vmem:[%s486_s1 + $0x10] sm:$0xff]  ;;  %337 = vmatprep.mubr.msk.f32.mxu0 %vm377_vm0, %v376_v0  ;;  %v30_v4 = vld [vmem:[%s486_s1 + $0x8] sm:$0xff]  ;;  %v12_v23 = vstv %s491_s6  ;;  %vm297_vm3 = vcmask 7168  }
   0x2   :  { %330 = vmatpush3.msra.mxu0 %v32_v1  ;;  %340 = vmatprep.subr.mxu1 %v376_v0  ;;  %v122_v3 = vld [vmem:[%s487_s3 + $0x38] sm:$0xff]  ;;  %v121_v5 = vld [vmem:[%s487_s3 + $0x30] sm:$0xff]  ;;  %v120_v6 = vld [vmem:[%s487_s3 + $0x28] sm:$0xff]  ;;  %13 = vst [vmem:[#allocation2] sm:$0x1] %v12_v23 }
   0x3   :  { %331 = vmatprep.subr.mxu0 %v376_v0  ;;  %341 = vmatpush3.msra.mxu1 %v122_v3  ;;  %v29_v7 = vld [vmem:[%s486_s1] sm:$0xff]  ;;  %v118_v10 = vld [vmem:[%s487_s3 + $0x18] sm:$0xff]  ;;  %v117_v11 = vld [vmem:[%s487_s3 + $0x10] sm:$0xff] }
   0x4   :  { %332 = vmatpush3.msra.mxu0 %v31_v2  ;;  %342 = vmatprep.subr.mxu1 %v376_v0  ;;  %v28_v8 = vld [vmem:[%s488_s0] sm:$0xff]  ;;  %v116_v12 = vld [vmem:[%s487_s3 + $0x8] sm:$0xff]  ;;  %v208_v14 = vld [vmem:[%s489_s5 + $0x18] sm:$0xff] }
   0x5   :  { %333 = vmatprep.subr.mxu0 %v376_v0  ;;  %343 = vmatpush3.msra.mxu1 %v121_v5  ;;  %v119_v9 = vld [vmem:[%s487_s3 + $0x20] sm:$0xff]  ;;  %v207_v20 = vld [vmem:[%s489_s5 + $0x10] sm:$0xff]  ;;  %v206_v21 = vld [vmem:[%s489_s5 + $0x8] sm:$0xff] }
   0x6   :  { %334 = vmatpush3.msra.mxu0 %v30_v4  ;;  %344 = vmatprep.subr.mxu1 %v376_v0  ;;  %v115_v13 = vld [vmem:[%s487_s3] sm:$0xff] }
   0x7   :  { %335 = vmatprep.subr.mxu0 %v376_v0  ;;  %345 = vmatpush3.msra.mxu1 %v120_v6  ;;  %v303_v15 = vld [vmem:[%s490_s2] ss:$0 sm:$0xff] }
   0x8   :  { %336 = vmatpush3.msra.mxu0 %v29_v7  ;;  %346 = vmatprep.subr.mxu1 %v376_v0  ;;  %v205_v22 = vld [vmem:[%s489_s5] sm:$0xff] }
   0x9   :  { %338 = vmatmul.mubr.msk.f32.vlgmr.msra.gmra.mxu0 %vm40_vm1, %v28_v8  ;;  %347 = vmatpush3.msra.mxu1 %v119_v9  ;;  %v305_v24 = vld [vmem:[%s492_s4] ss:$0 sm:$0xff] }
   0xa   :  { %348 = vmatprep.subr.mxu1 %v376_v0  ;;  %356 = vmatprep.mubr.msk.f32.mxu1 %vm377_vm0, %v376_v0  ;;  %v308_v29 = vld [vmem:[#allocation2] ss:$0 sm:$0xff] }
   0xb   :  { %349 = vmatpush3.msra.mxu1 %v118_v10  ;;  %359 = vmatprep.subr.mxu0 %v376_v0 }
   0xc   :  { %350 = vmatprep.subr.mxu1 %v376_v0  ;;  %367 = vmatprep.mubr.msk.f32.mxu0 %vm377_vm0, %v376_v0 }
   0xd   :  { %351 = vmatpush3.msra.mxu1 %v117_v11  ;;  %360 = vmatpush3.msra.mxu0 %v208_v14 }
   0xe   :  { %352 = vmatprep.subr.mxu1 %v376_v0  ;;  %361 = vmatprep.subr.mxu0 %v376_v0 }
   0xf   :  { %353 = vmatpush3.msra.mxu1 %v116_v12  ;;  %362 = vmatpush3.msra.mxu0 %v207_v20 }
  0x10   :  { %354 = vmatprep.subr.mxu1 %v376_v0  ;;  %363 = vmatprep.subr.mxu0 %v376_v0 }
  0x11   :  { %355 = vmatpush3.msra.mxu1 %v115_v13  ;;  %364 = vmatpush3.msra.mxu0 %v206_v21 }
  0x12   :  { %365 = vmatprep.subr.mxu0 %v376_v0 }
  0x13   :  { %366 = vmatpush3.msra.mxu0 %v205_v22 }
  0xc9   :  { %v110_v16 = vpop.f32.mrf.mxu0 }
  0xca   :  { %v111_v17 = vadd.f32 %v303_v15, %v110_v16 }
  0xcb   :  { %v339_v18 = vpop.f32.mrf.mxu0 }
  0xcc   :  { %v114_v19 = vmax.f32 %v111_v17, 0.0 }
  0xce   :  { %357 = vmatmul.mubr.msk.f32.vlgmr.msra.gmra.mxu1 %vm130_vm2, %v114_v19 }
 0x18e   :  { %v200_v25 = vpop.f32.mrf.mxu1 }
 0x18f   :  { %v201_v26 = vadd.f32 %v305_v24, %v200_v25 }
 0x190   :  { %v358_v27 = vpop.f32.mrf.mxu1 }
 0x191   :  { %v204_v28 = vmax.f32 %v201_v26, 0.0 }
 0x193   :  { %368 = vmatmul.mubr.msk.f32.vlgmr.msra.gmra.mxu0 %vm40_vm1, %v204_v28 }
 0x253   :  { %v279_v30 = vpop.f32.mrf.mxu0 }
 0x254   :  { %v289_v31 = vadd.f32 %v308_v29, %v279_v30 }
 0x255   :  { %v369_v32 = vpop.f32.mrf.mxu0 }
 0x256   :  { %v309_v33 = vclamps-f32 %v289_v31, 30.0 }
 0x258   :  { %v292_v34 = vsub.f32 0.0, %v309_v33 }
 0x25a   :  { %v293_v35 = vmul.f32 1.442695, %v292_v34 }
 0x25c   :  { %372 = vpow2.f32 %v293_v35 }
 0x269   :  { %v373_v36 = vpop.eup %372 }
 0x26a   :  { %v295_v37 = vadd.f32 1.0, %v373_v36 }
 0x26c   :  { %374 = vrcp.f32 %v295_v37 }
 0x279   :  { %v375_v38 = vpop.eup %374 }
 0x27a   :  { %298 = vst.msk [vmem:[%s493_s7] sm:$0xff] %vm297_vm3, %v375_v38 }

</bundles_post_ra>
